<compile_context>
chip_gen: v5e
topology: v5e:2x2
jax: 0.10.0
libtpu: 0.0.40
codegen_flags: <defaults>
</compile_context>

<pallas_src>
import functools

import jax
import jax.numpy as jnp
from jax import lax
from jax.experimental import pallas as pl
from jax.experimental.pallas import tpu as pltpu


def _round_up(x, m):
    return ((x + m - 1) // m) * m


def word2vec_kernel(idx_ref, emb_hbm, w_ref, b_ref, out_ref, emb_vmem, gather_sem):
    # idx_ref    : (N_pad,) int32, SMEM (scalar prefetch)
    # emb_hbm    : (V, D)  f32 ref left in HBM (memory_space=pl.ANY)
    # w_ref      : (TV, D) bf16 VMEM tile of the fc weight (kept (V, D) layout)
    # b_ref      : (1, TV) f32 VMEM tile of the fc bias
    # out_ref    : (N_pad, TV) f32 output tile
    # emb_vmem   : (N_pad, D) f32 scratch holding the gathered embedding rows
    # gather_sem : (N_pad,) DMA semaphores
    n_pad = emb_vmem.shape[0]

    # Row gather: DMA only the N needed rows (N*D bytes) of the embedding
    # table.  Re-issued every grid step so the kernel remains correct when the
    # vocab axis is sharded across TensorCores ("parallel"); the cost is tiny
    # relative to the (TV, D) weight-tile stream.
    copies = []
    for i in range(n_pad):
        cp = pltpu.make_async_copy(
            emb_hbm.at[pl.ds(idx_ref[i], 1)],   # (1, D) row of the table (HBM)
            emb_vmem.at[pl.ds(i, 1)],           # (1, D) slot in VMEM scratch
            gather_sem.at[i],
        )
        cp.start()
        copies.append(cp)
    for cp in copies:
        cp.wait()

    # Projection on the MXU: (N, D) x (TV, D) -> (N, TV), bf16 inputs with f32
    # accumulation, f32 bias added afterwards.
    emb = emb_vmem[...].astype(jnp.bfloat16)
    logits = lax.dot_general(
        emb, w_ref[...],
        dimension_numbers=(((1,), (1,)), ((), ())),
        preferred_element_type=jnp.float32,
    )
    out_ref[...] = logits + b_ref[...]


@functools.partial(jax.jit, static_argnames=("tv",))
def word2vec_forward(indices, emb_table, fc_weight, fc_bias, *, tv=2048):
    """indices: int (B, S); emb_table: (V, D); fc_weight: (V, D); fc_bias: (V,)."""
    b, s = indices.shape
    v, d = emb_table.shape
    n = b * s

    # Pad N to a multiple of 8 sublanes; pick a lane-dense vocab tile (mult of
    # 128) and pad V up to a multiple of it.
    n_pad = max(8, _round_up(n, 8))
    tv = min(_round_up(tv, 128), _round_up(v, 128))
    v_pad = _round_up(v, tv)
    num_tiles = v_pad // tv

    # Token ids -> SMEM scalar prefetch.  Clamp (PyTorch would raise on OOB).
    idx = jnp.clip(indices.reshape(-1).astype(jnp.int32), 0, v - 1)
    idx = jnp.pad(idx, (0, n_pad - n))

    # fc weight stays (V, D) (no transposed HBM copy); pad the vocab dim and
    # ship in bf16 to halve the dominant HBM weight stream.
    w = jnp.pad(fc_weight, ((0, v_pad - v), (0, 0))).astype(jnp.bfloat16)
    bias = jnp.pad(fc_bias, (0, v_pad - v)).reshape(1, v_pad).astype(jnp.float32)

    cost = pl.CostEstimate(
        flops=2 * n_pad * d * v_pad,
        transcendentals=0,
        bytes_accessed=(v_pad * d * 2                 # bf16 weight stream
                        + v_pad * 4                   # bias
                        + num_tiles * n_pad * d * 4   # re-gathered emb rows
                        + n_pad * v_pad * 4),         # output
    )

    grid_spec = pltpu.PrefetchScalarGridSpec(
        num_scalar_prefetch=1,
        grid=(num_tiles,),
        in_specs=[
            pl.BlockSpec(memory_space=pl.ANY),                    # emb table (HBM)
            pl.BlockSpec((tv, d), lambda j, idx_ref: (j, 0)),     # weight tile
            pl.BlockSpec((1, tv), lambda j, idx_ref: (0, j)),     # bias tile
        ],
        out_specs=pl.BlockSpec((n_pad, tv), lambda j, idx_ref: (0, j)),
        scratch_shapes=[
            pltpu.VMEM((n_pad, d), jnp.float32),
            pltpu.SemaphoreType.DMA((n_pad,)),
        ],
    )

    out = pl.pallas_call(
        word2vec_kernel,
        out_shape=jax.ShapeDtypeStruct((n_pad, v_pad), jnp.float32),
        grid_spec=grid_spec,
        compiler_params=pltpu.CompilerParams(
            dimension_semantics=("parallel",),
            vmem_limit_bytes=32 * 1024 * 1024,
        ),
        cost_estimate=cost,
    )(idx, emb_table, w, bias)

    return out[:n, :v].reshape(b, s, v)


if __name__ == "__main__":
    # Small, deterministic configuration.
    num_embeddings = 256   # vocab size V
    embedding_dim = 128    # D
    batch, seq = 2, 8

    key = jax.random.PRNGKey(0)
    k_idx, k_emb, k_w, k_b = jax.random.split(key, 4)

    # Deterministic parameter init (shapes match nn.Embedding / nn.Linear).
    emb_table = jax.random.normal(k_emb, (num_embeddings, embedding_dim), jnp.float32)
    bound = 1.0 / (embedding_dim ** 0.5)
    fc_weight = jax.random.uniform(
        k_w, (num_embeddings, embedding_dim), jnp.float32, -bound, bound)
    fc_bias = jax.random.uniform(
        k_b, (num_embeddings,), jnp.float32, -bound, bound)

    indices = jax.random.randint(k_idx, (batch, seq), 0, num_embeddings, jnp.int32)

    # tv=128 so the demo exercises a multi-tile vocab grid (grid=(2,)).
    out = word2vec_forward(indices, emb_table, fc_weight, fc_bias, tv=128)
    out = jax.block_until_ready(out)

    # Plain-JAX f32 reference (gather + linear).  The kernel runs the matmul
    # with bf16 inputs and f32 accumulation, so compare with a bf16-level
    # tolerance.
    gathered = emb_table[indices]
    ref = jnp.einsum("bsd,vd->bsv", gathered, fc_weight,
                     preferred_element_type=jnp.float32) + fc_bias

    assert out.shape == (batch, seq, num_embeddings)
    assert out.dtype == jnp.float32
    assert jnp.allclose(out, ref, atol=5e-2, rtol=5e-2)

    print("KERNEL_OK")
</pallas_src>

<mosaic_0001>
module attributes {stable_mosaic.version = 11 : i64} {
  func.func @word2vec_kernel(%arg0: i32, %arg1: memref<16xi32, #tpu.memory_space<smem>>, %arg2: memref<256x128xf32, #tpu.memory_space<any>>, %arg3: memref<128x128xbf16, #tpu.memory_space<vmem>>, %arg4: memref<1x128xf32, #tpu.memory_space<vmem>>, %arg5: memref<16x128xf32, #tpu.memory_space<vmem>>, %arg6: memref<16x128xf32, #tpu.memory_space<vmem>>, %arg7: memref<16x!tpu.dma_semaphore, #tpu.memory_space<semaphore_mem>>) attributes {dimension_semantics = [#tpu.dimension_semantics<parallel>], iteration_bounds = array<i64: 2>, scalar_prefetch = 1 : i64, scratch_operands = 2 : i64, tpu.core_type = #tpu.core_type<tc>, window_params = [{}, {transform_indices = @transform_1, window_bounds = array<i64: 128, 128>}, {transform_indices = @transform_2, window_bounds = array<i64: 1, 128>}, {transform_indices = @transform_3, window_bounds = array<i64: 16, 128>}]} {
    %c0 = arith.constant 0 : index
    %0 = memref.load %arg1[%c0] : memref<16xi32, #tpu.memory_space<smem>>
    %c0_i32 = arith.constant 0 : i32
    %c0_i32_0 = arith.constant 0 : i32
    %1 = tpu.memref_slice %arg2[%0, %c0_i32_0] : memref<256x128xf32, #tpu.memory_space<any>> -> memref<1x128xf32, #tpu.memory_space<any>>
    %c0_i32_1 = arith.constant 0 : i32
    %c0_i32_2 = arith.constant 0 : i32
    %2 = tpu.memref_slice %arg6[%c0_i32_1, %c0_i32_2] : memref<16x128xf32, #tpu.memory_space<vmem>> -> memref<1x128xf32, #tpu.memory_space<vmem>>
    %3 = tpu.memref_slice %arg7[%c0_i32] : memref<16x!tpu.dma_semaphore, #tpu.memory_space<semaphore_mem>> -> memref<1x!tpu.dma_semaphore, #tpu.memory_space<semaphore_mem>>
    %4 = tpu.memref_squeeze %3 : memref<1x!tpu.dma_semaphore, #tpu.memory_space<semaphore_mem>> -> memref<!tpu.dma_semaphore, #tpu.memory_space<semaphore_mem>>
    tpu.enqueue_dma source(%1 : memref<1x128xf32, #tpu.memory_space<any>>) target(%2 : memref<1x128xf32, #tpu.memory_space<vmem>>) target_semaphore(%4 : memref<!tpu.dma_semaphore, #tpu.memory_space<semaphore_mem>>)
    %c1 = arith.constant 1 : index
    %5 = memref.load %arg1[%c1] : memref<16xi32, #tpu.memory_space<smem>>
    %c1_i32 = arith.constant 1 : i32
    %c0_i32_3 = arith.constant 0 : i32
    %6 = tpu.memref_slice %arg2[%5, %c0_i32_3] : memref<256x128xf32, #tpu.memory_space<any>> -> memref<1x128xf32, #tpu.memory_space<any>>
    %c1_i32_4 = arith.constant 1 : i32
    %c0_i32_5 = arith.constant 0 : i32
    %7 = tpu.memref_slice %arg6[%c1_i32_4, %c0_i32_5] : memref<16x128xf32, #tpu.memory_space<vmem>> -> memref<1x128xf32, #tpu.memory_space<vmem>>
    %8 = tpu.memref_slice %arg7[%c1_i32] : memref<16x!tpu.dma_semaphore, #tpu.memory_space<semaphore_mem>> -> memref<1x!tpu.dma_semaphore, #tpu.memory_space<semaphore_mem>>
    %9 = tpu.memref_squeeze %8 : memref<1x!tpu.dma_semaphore, #tpu.memory_space<semaphore_mem>> -> memref<!tpu.dma_semaphore, #tpu.memory_space<semaphore_mem>>
    tpu.enqueue_dma source(%6 : memref<1x128xf32, #tpu.memory_space<any>>) target(%7 : memref<1x128xf32, #tpu.memory_space<vmem>>) target_semaphore(%9 : memref<!tpu.dma_semaphore, #tpu.memory_space<semaphore_mem>>)
    %c2 = arith.constant 2 : index
    %10 = memref.load %arg1[%c2] : memref<16xi32, #tpu.memory_space<smem>>
    %c2_i32 = arith.constant 2 : i32
    %c0_i32_6 = arith.constant 0 : i32
    %11 = tpu.memref_slice %arg2[%10, %c0_i32_6] : memref<256x128xf32, #tpu.memory_space<any>> -> memref<1x128xf32, #tpu.memory_space<any>>
    %c2_i32_7 = arith.constant 2 : i32
    %c0_i32_8 = arith.constant 0 : i32
    %12 = tpu.memref_slice %arg6[%c2_i32_7, %c0_i32_8] : memref<16x128xf32, #tpu.memory_space<vmem>> -> memref<1x128xf32, #tpu.memory_space<vmem>>
    %13 = tpu.memref_slice %arg7[%c2_i32] : memref<16x!tpu.dma_semaphore, #tpu.memory_space<semaphore_mem>> -> memref<1x!tpu.dma_semaphore, #tpu.memory_space<semaphore_mem>>
    %14 = tpu.memref_squeeze %13 : memref<1x!tpu.dma_semaphore, #tpu.memory_space<semaphore_mem>> -> memref<!tpu.dma_semaphore, #tpu.memory_space<semaphore_mem>>
    tpu.enqueue_dma source(%11 : memref<1x128xf32, #tpu.memory_space<any>>) target(%12 : memref<1x128xf32, #tpu.memory_space<vmem>>) target_semaphore(%14 : memref<!tpu.dma_semaphore, #tpu.memory_space<semaphore_mem>>)
    %c3 = arith.constant 3 : index
    %15 = memref.load %arg1[%c3] : memref<16xi32, #tpu.memory_space<smem>>
    %c3_i32 = arith.constant 3 : i32
    %c0_i32_9 = arith.constant 0 : i32
    %16 = tpu.memref_slice %arg2[%15, %c0_i32_9] : memref<256x128xf32, #tpu.memory_space<any>> -> memref<1x128xf32, #tpu.memory_space<any>>
    %c3_i32_10 = arith.constant 3 : i32
    %c0_i32_11 = arith.constant 0 : i32
    %17 = tpu.memref_slice %arg6[%c3_i32_10, %c0_i32_11] : memref<16x128xf32, #tpu.memory_space<vmem>> -> memref<1x128xf32, #tpu.memory_space<vmem>>
    %18 = tpu.memref_slice %arg7[%c3_i32] : memref<16x!tpu.dma_semaphore, #tpu.memory_space<semaphore_mem>> -> memref<1x!tpu.dma_semaphore, #tpu.memory_space<semaphore_mem>>
    %19 = tpu.memref_squeeze %18 : memref<1x!tpu.dma_semaphore, #tpu.memory_space<semaphore_mem>> -> memref<!tpu.dma_semaphore, #tpu.memory_space<semaphore_mem>>
    tpu.enqueue_dma source(%16 : memref<1x128xf32, #tpu.memory_space<any>>) target(%17 : memref<1x128xf32, #tpu.memory_space<vmem>>) target_semaphore(%19 : memref<!tpu.dma_semaphore, #tpu.memory_space<semaphore_mem>>)
    %c4 = arith.constant 4 : index
    %20 = memref.load %arg1[%c4] : memref<16xi32, #tpu.memory_space<smem>>
    %c4_i32 = arith.constant 4 : i32
    %c0_i32_12 = arith.constant 0 : i32
    %21 = tpu.memref_slice %arg2[%20, %c0_i32_12] : memref<256x128xf32, #tpu.memory_space<any>> -> memref<1x128xf32, #tpu.memory_space<any>>
    %c4_i32_13 = arith.constant 4 : i32
    %c0_i32_14 = arith.constant 0 : i32
    %22 = tpu.memref_slice %arg6[%c4_i32_13, %c0_i32_14] : memref<16x128xf32, #tpu.memory_space<vmem>> -> memref<1x128xf32, #tpu.memory_space<vmem>>
    %23 = tpu.memref_slice %arg7[%c4_i32] : memref<16x!tpu.dma_semaphore, #tpu.memory_space<semaphore_mem>> -> memref<1x!tpu.dma_semaphore, #tpu.memory_space<semaphore_mem>>
    %24 = tpu.memref_squeeze %23 : memref<1x!tpu.dma_semaphore, #tpu.memory_space<semaphore_mem>> -> memref<!tpu.dma_semaphore, #tpu.memory_space<semaphore_mem>>
    tpu.enqueue_dma source(%21 : memref<1x128xf32, #tpu.memory_space<any>>) target(%22 : memref<1x128xf32, #tpu.memory_space<vmem>>) target_semaphore(%24 : memref<!tpu.dma_semaphore, #tpu.memory_space<semaphore_mem>>)
    %c5 = arith.constant 5 : index
    %25 = memref.load %arg1[%c5] : memref<16xi32, #tpu.memory_space<smem>>
    %c5_i32 = arith.constant 5 : i32
    %c0_i32_15 = arith.constant 0 : i32
    %26 = tpu.memref_slice %arg2[%25, %c0_i32_15] : memref<256x128xf32, #tpu.memory_space<any>> -> memref<1x128xf32, #tpu.memory_space<any>>
    %c5_i32_16 = arith.constant 5 : i32
    %c0_i32_17 = arith.constant 0 : i32
    %27 = tpu.memref_slice %arg6[%c5_i32_16, %c0_i32_17] : memref<16x128xf32, #tpu.memory_space<vmem>> -> memref<1x128xf32, #tpu.memory_space<vmem>>
    %28 = tpu.memref_slice %arg7[%c5_i32] : memref<16x!tpu.dma_semaphore, #tpu.memory_space<semaphore_mem>> -> memref<1x!tpu.dma_semaphore, #tpu.memory_space<semaphore_mem>>
    %29 = tpu.memref_squeeze %28 : memref<1x!tpu.dma_semaphore, #tpu.memory_space<semaphore_mem>> -> memref<!tpu.dma_semaphore, #tpu.memory_space<semaphore_mem>>
    tpu.enqueue_dma source(%26 : memref<1x128xf32, #tpu.memory_space<any>>) target(%27 : memref<1x128xf32, #tpu.memory_space<vmem>>) target_semaphore(%29 : memref<!tpu.dma_semaphore, #tpu.memory_space<semaphore_mem>>)
    %c6 = arith.constant 6 : index
    %30 = memref.load %arg1[%c6] : memref<16xi32, #tpu.memory_space<smem>>
    %c6_i32 = arith.constant 6 : i32
    %c0_i32_18 = arith.constant 0 : i32
    %31 = tpu.memref_slice %arg2[%30, %c0_i32_18] : memref<256x128xf32, #tpu.memory_space<any>> -> memref<1x128xf32, #tpu.memory_space<any>>
    %c6_i32_19 = arith.constant 6 : i32
    %c0_i32_20 = arith.constant 0 : i32
    %32 = tpu.memref_slice %arg6[%c6_i32_19, %c0_i32_20] : memref<16x128xf32, #tpu.memory_space<vmem>> -> memref<1x128xf32, #tpu.memory_space<vmem>>
    %33 = tpu.memref_slice %arg7[%c6_i32] : memref<16x!tpu.dma_semaphore, #tpu.memory_space<semaphore_mem>> -> memref<1x!tpu.dma_semaphore, #tpu.memory_space<semaphore_mem>>
    %34 = tpu.memref_squeeze %33 : memref<1x!tpu.dma_semaphore, #tpu.memory_space<semaphore_mem>> -> memref<!tpu.dma_semaphore, #tpu.memory_space<semaphore_mem>>
    tpu.enqueue_dma source(%31 : memref<1x128xf32, #tpu.memory_space<any>>) target(%32 : memref<1x128xf32, #tpu.memory_space<vmem>>) target_semaphore(%34 : memref<!tpu.dma_semaphore, #tpu.memory_space<semaphore_mem>>)
    %c7 = arith.constant 7 : index
    %35 = memref.load %arg1[%c7] : memref<16xi32, #tpu.memory_space<smem>>
    %c7_i32 = arith.constant 7 : i32
    %c0_i32_21 = arith.constant 0 : i32
    %36 = tpu.memref_slice %arg2[%35, %c0_i32_21] : memref<256x128xf32, #tpu.memory_space<any>> -> memref<1x128xf32, #tpu.memory_space<any>>
    %c7_i32_22 = arith.constant 7 : i32
    %c0_i32_23 = arith.constant 0 : i32
    %37 = tpu.memref_slice %arg6[%c7_i32_22, %c0_i32_23] : memref<16x128xf32, #tpu.memory_space<vmem>> -> memref<1x128xf32, #tpu.memory_space<vmem>>
    %38 = tpu.memref_slice %arg7[%c7_i32] : memref<16x!tpu.dma_semaphore, #tpu.memory_space<semaphore_mem>> -> memref<1x!tpu.dma_semaphore, #tpu.memory_space<semaphore_mem>>
    %39 = tpu.memref_squeeze %38 : memref<1x!tpu.dma_semaphore, #tpu.memory_space<semaphore_mem>> -> memref<!tpu.dma_semaphore, #tpu.memory_space<semaphore_mem>>
    tpu.enqueue_dma source(%36 : memref<1x128xf32, #tpu.memory_space<any>>) target(%37 : memref<1x128xf32, #tpu.memory_space<vmem>>) target_semaphore(%39 : memref<!tpu.dma_semaphore, #tpu.memory_space<semaphore_mem>>)
    %c8 = arith.constant 8 : index
    %40 = memref.load %arg1[%c8] : memref<16xi32, #tpu.memory_space<smem>>
    %c8_i32 = arith.constant 8 : i32
    %c0_i32_24 = arith.constant 0 : i32
    %41 = tpu.memref_slice %arg2[%40, %c0_i32_24] : memref<256x128xf32, #tpu.memory_space<any>> -> memref<1x128xf32, #tpu.memory_space<any>>
    %c8_i32_25 = arith.constant 8 : i32
    %c0_i32_26 = arith.constant 0 : i32
    %42 = tpu.memref_slice %arg6[%c8_i32_25, %c0_i32_26] : memref<16x128xf32, #tpu.memory_space<vmem>> -> memref<1x128xf32, #tpu.memory_space<vmem>>
    %43 = tpu.memref_slice %arg7[%c8_i32] : memref<16x!tpu.dma_semaphore, #tpu.memory_space<semaphore_mem>> -> memref<1x!tpu.dma_semaphore, #tpu.memory_space<semaphore_mem>>
    %44 = tpu.memref_squeeze %43 : memref<1x!tpu.dma_semaphore, #tpu.memory_space<semaphore_mem>> -> memref<!tpu.dma_semaphore, #tpu.memory_space<semaphore_mem>>
    tpu.enqueue_dma source(%41 : memref<1x128xf32, #tpu.memory_space<any>>) target(%42 : memref<1x128xf32, #tpu.memory_space<vmem>>) target_semaphore(%44 : memref<!tpu.dma_semaphore, #tpu.memory_space<semaphore_mem>>)
    %c9 = arith.constant 9 : index
    %45 = memref.load %arg1[%c9] : memref<16xi32, #tpu.memory_space<smem>>
    %c9_i32 = arith.constant 9 : i32
    %c0_i32_27 = arith.constant 0 : i32
    %46 = tpu.memref_slice %arg2[%45, %c0_i32_27] : memref<256x128xf32, #tpu.memory_space<any>> -> memref<1x128xf32, #tpu.memory_space<any>>
    %c9_i32_28 = arith.constant 9 : i32
    %c0_i32_29 = arith.constant 0 : i32
    %47 = tpu.memref_slice %arg6[%c9_i32_28, %c0_i32_29] : memref<16x128xf32, #tpu.memory_space<vmem>> -> memref<1x128xf32, #tpu.memory_space<vmem>>
    %48 = tpu.memref_slice %arg7[%c9_i32] : memref<16x!tpu.dma_semaphore, #tpu.memory_space<semaphore_mem>> -> memref<1x!tpu.dma_semaphore, #tpu.memory_space<semaphore_mem>>
    %49 = tpu.memref_squeeze %48 : memref<1x!tpu.dma_semaphore, #tpu.memory_space<semaphore_mem>> -> memref<!tpu.dma_semaphore, #tpu.memory_space<semaphore_mem>>
    tpu.enqueue_dma source(%46 : memref<1x128xf32, #tpu.memory_space<any>>) target(%47 : memref<1x128xf32, #tpu.memory_space<vmem>>) target_semaphore(%49 : memref<!tpu.dma_semaphore, #tpu.memory_space<semaphore_mem>>)
    %c10 = arith.constant 10 : index
    %50 = memref.load %arg1[%c10] : memref<16xi32, #tpu.memory_space<smem>>
    %c10_i32 = arith.constant 10 : i32
    %c0_i32_30 = arith.constant 0 : i32
    %51 = tpu.memref_slice %arg2[%50, %c0_i32_30] : memref<256x128xf32, #tpu.memory_space<any>> -> memref<1x128xf32, #tpu.memory_space<any>>
    %c10_i32_31 = arith.constant 10 : i32
    %c0_i32_32 = arith.constant 0 : i32
    %52 = tpu.memref_slice %arg6[%c10_i32_31, %c0_i32_32] : memref<16x128xf32, #tpu.memory_space<vmem>> -> memref<1x128xf32, #tpu.memory_space<vmem>>
    %53 = tpu.memref_slice %arg7[%c10_i32] : memref<16x!tpu.dma_semaphore, #tpu.memory_space<semaphore_mem>> -> memref<1x!tpu.dma_semaphore, #tpu.memory_space<semaphore_mem>>
    %54 = tpu.memref_squeeze %53 : memref<1x!tpu.dma_semaphore, #tpu.memory_space<semaphore_mem>> -> memref<!tpu.dma_semaphore, #tpu.memory_space<semaphore_mem>>
    tpu.enqueue_dma source(%51 : memref<1x128xf32, #tpu.memory_space<any>>) target(%52 : memref<1x128xf32, #tpu.memory_space<vmem>>) target_semaphore(%54 : memref<!tpu.dma_semaphore, #tpu.memory_space<semaphore_mem>>)
    %c11 = arith.constant 11 : index
    %55 = memref.load %arg1[%c11] : memref<16xi32, #tpu.memory_space<smem>>
    %c11_i32 = arith.constant 11 : i32
    %c0_i32_33 = arith.constant 0 : i32
    %56 = tpu.memref_slice %arg2[%55, %c0_i32_33] : memref<256x128xf32, #tpu.memory_space<any>> -> memref<1x128xf32, #tpu.memory_space<any>>
    %c11_i32_34 = arith.constant 11 : i32
    %c0_i32_35 = arith.constant 0 : i32
    %57 = tpu.memref_slice %arg6[%c11_i32_34, %c0_i32_35] : memref<16x128xf32, #tpu.memory_space<vmem>> -> memref<1x128xf32, #tpu.memory_space<vmem>>
    %58 = tpu.memref_slice %arg7[%c11_i32] : memref<16x!tpu.dma_semaphore, #tpu.memory_space<semaphore_mem>> -> memref<1x!tpu.dma_semaphore, #tpu.memory_space<semaphore_mem>>
    %59 = tpu.memref_squeeze %58 : memref<1x!tpu.dma_semaphore, #tpu.memory_space<semaphore_mem>> -> memref<!tpu.dma_semaphore, #tpu.memory_space<semaphore_mem>>
    tpu.enqueue_dma source(%56 : memref<1x128xf32, #tpu.memory_space<any>>) target(%57 : memref<1x128xf32, #tpu.memory_space<vmem>>) target_semaphore(%59 : memref<!tpu.dma_semaphore, #tpu.memory_space<semaphore_mem>>)
    %c12 = arith.constant 12 : index
    %60 = memref.load %arg1[%c12] : memref<16xi32, #tpu.memory_space<smem>>
    %c12_i32 = arith.constant 12 : i32
    %c0_i32_36 = arith.constant 0 : i32
    %61 = tpu.memref_slice %arg2[%60, %c0_i32_36] : memref<256x128xf32, #tpu.memory_space<any>> -> memref<1x128xf32, #tpu.memory_space<any>>
    %c12_i32_37 = arith.constant 12 : i32
    %c0_i32_38 = arith.constant 0 : i32
    %62 = tpu.memref_slice %arg6[%c12_i32_37, %c0_i32_38] : memref<16x128xf32, #tpu.memory_space<vmem>> -> memref<1x128xf32, #tpu.memory_space<vmem>>
    %63 = tpu.memref_slice %arg7[%c12_i32] : memref<16x!tpu.dma_semaphore, #tpu.memory_space<semaphore_mem>> -> memref<1x!tpu.dma_semaphore, #tpu.memory_space<semaphore_mem>>
    %64 = tpu.memref_squeeze %63 : memref<1x!tpu.dma_semaphore, #tpu.memory_space<semaphore_mem>> -> memref<!tpu.dma_semaphore, #tpu.memory_space<semaphore_mem>>
    tpu.enqueue_dma source(%61 : memref<1x128xf32, #tpu.memory_space<any>>) target(%62 : memref<1x128xf32, #tpu.memory_space<vmem>>) target_semaphore(%64 : memref<!tpu.dma_semaphore, #tpu.memory_space<semaphore_mem>>)
    %c13 = arith.constant 13 : index
    %65 = memref.load %arg1[%c13] : memref<16xi32, #tpu.memory_space<smem>>
    %c13_i32 = arith.constant 13 : i32
    %c0_i32_39 = arith.constant 0 : i32
    %66 = tpu.memref_slice %arg2[%65, %c0_i32_39] : memref<256x128xf32, #tpu.memory_space<any>> -> memref<1x128xf32, #tpu.memory_space<any>>
    %c13_i32_40 = arith.constant 13 : i32
    %c0_i32_41 = arith.constant 0 : i32
    %67 = tpu.memref_slice %arg6[%c13_i32_40, %c0_i32_41] : memref<16x128xf32, #tpu.memory_space<vmem>> -> memref<1x128xf32, #tpu.memory_space<vmem>>
    %68 = tpu.memref_slice %arg7[%c13_i32] : memref<16x!tpu.dma_semaphore, #tpu.memory_space<semaphore_mem>> -> memref<1x!tpu.dma_semaphore, #tpu.memory_space<semaphore_mem>>
    %69 = tpu.memref_squeeze %68 : memref<1x!tpu.dma_semaphore, #tpu.memory_space<semaphore_mem>> -> memref<!tpu.dma_semaphore, #tpu.memory_space<semaphore_mem>>
    tpu.enqueue_dma source(%66 : memref<1x128xf32, #tpu.memory_space<any>>) target(%67 : memref<1x128xf32, #tpu.memory_space<vmem>>) target_semaphore(%69 : memref<!tpu.dma_semaphore, #tpu.memory_space<semaphore_mem>>)
    %c14 = arith.constant 14 : index
    %70 = memref.load %arg1[%c14] : memref<16xi32, #tpu.memory_space<smem>>
    %c14_i32 = arith.constant 14 : i32
    %c0_i32_42 = arith.constant 0 : i32
    %71 = tpu.memref_slice %arg2[%70, %c0_i32_42] : memref<256x128xf32, #tpu.memory_space<any>> -> memref<1x128xf32, #tpu.memory_space<any>>
    %c14_i32_43 = arith.constant 14 : i32
    %c0_i32_44 = arith.constant 0 : i32
    %72 = tpu.memref_slice %arg6[%c14_i32_43, %c0_i32_44] : memref<16x128xf32, #tpu.memory_space<vmem>> -> memref<1x128xf32, #tpu.memory_space<vmem>>
    %73 = tpu.memref_slice %arg7[%c14_i32] : memref<16x!tpu.dma_semaphore, #tpu.memory_space<semaphore_mem>> -> memref<1x!tpu.dma_semaphore, #tpu.memory_space<semaphore_mem>>
    %74 = tpu.memref_squeeze %73 : memref<1x!tpu.dma_semaphore, #tpu.memory_space<semaphore_mem>> -> memref<!tpu.dma_semaphore, #tpu.memory_space<semaphore_mem>>
    tpu.enqueue_dma source(%71 : memref<1x128xf32, #tpu.memory_space<any>>) target(%72 : memref<1x128xf32, #tpu.memory_space<vmem>>) target_semaphore(%74 : memref<!tpu.dma_semaphore, #tpu.memory_space<semaphore_mem>>)
    %c15 = arith.constant 15 : index
    %75 = memref.load %arg1[%c15] : memref<16xi32, #tpu.memory_space<smem>>
    %c15_i32 = arith.constant 15 : i32
    %c0_i32_45 = arith.constant 0 : i32
    %76 = tpu.memref_slice %arg2[%75, %c0_i32_45] : memref<256x128xf32, #tpu.memory_space<any>> -> memref<1x128xf32, #tpu.memory_space<any>>
    %c15_i32_46 = arith.constant 15 : i32
    %c0_i32_47 = arith.constant 0 : i32
    %77 = tpu.memref_slice %arg6[%c15_i32_46, %c0_i32_47] : memref<16x128xf32, #tpu.memory_space<vmem>> -> memref<1x128xf32, #tpu.memory_space<vmem>>
    %78 = tpu.memref_slice %arg7[%c15_i32] : memref<16x!tpu.dma_semaphore, #tpu.memory_space<semaphore_mem>> -> memref<1x!tpu.dma_semaphore, #tpu.memory_space<semaphore_mem>>
    %79 = tpu.memref_squeeze %78 : memref<1x!tpu.dma_semaphore, #tpu.memory_space<semaphore_mem>> -> memref<!tpu.dma_semaphore, #tpu.memory_space<semaphore_mem>>
    tpu.enqueue_dma source(%76 : memref<1x128xf32, #tpu.memory_space<any>>) target(%77 : memref<1x128xf32, #tpu.memory_space<vmem>>) target_semaphore(%79 : memref<!tpu.dma_semaphore, #tpu.memory_space<semaphore_mem>>)
    %c0_i32_48 = arith.constant 0 : i32
    %c0_i32_49 = arith.constant 0 : i32
    %80 = tpu.memref_slice %arg2[%0, %c0_i32_49] : memref<256x128xf32, #tpu.memory_space<any>> -> memref<1x128xf32, #tpu.memory_space<any>>
    %c0_i32_50 = arith.constant 0 : i32
    %c0_i32_51 = arith.constant 0 : i32
    %81 = tpu.memref_slice %arg6[%c0_i32_50, %c0_i32_51] : memref<16x128xf32, #tpu.memory_space<vmem>> -> memref<1x128xf32, #tpu.memory_space<vmem>>
    %82 = tpu.memref_slice %arg7[%c0_i32_48] : memref<16x!tpu.dma_semaphore, #tpu.memory_space<semaphore_mem>> -> memref<1x!tpu.dma_semaphore, #tpu.memory_space<semaphore_mem>>
    %83 = tpu.memref_squeeze %82 : memref<1x!tpu.dma_semaphore, #tpu.memory_space<semaphore_mem>> -> memref<!tpu.dma_semaphore, #tpu.memory_space<semaphore_mem>>
    tpu.wait_dma2 semaphore(%83 : memref<!tpu.dma_semaphore, #tpu.memory_space<semaphore_mem>>) src(%80 : memref<1x128xf32, #tpu.memory_space<any>>) dst(%81 : memref<1x128xf32, #tpu.memory_space<vmem>>)
    %c1_i32_52 = arith.constant 1 : i32
    %c0_i32_53 = arith.constant 0 : i32
    %84 = tpu.memref_slice %arg2[%5, %c0_i32_53] : memref<256x128xf32, #tpu.memory_space<any>> -> memref<1x128xf32, #tpu.memory_space<any>>
    %c1_i32_54 = arith.constant 1 : i32
    %c0_i32_55 = arith.constant 0 : i32
    %85 = tpu.memref_slice %arg6[%c1_i32_54, %c0_i32_55] : memref<16x128xf32, #tpu.memory_space<vmem>> -> memref<1x128xf32, #tpu.memory_space<vmem>>
    %86 = tpu.memref_slice %arg7[%c1_i32_52] : memref<16x!tpu.dma_semaphore, #tpu.memory_space<semaphore_mem>> -> memref<1x!tpu.dma_semaphore, #tpu.memory_space<semaphore_mem>>
    %87 = tpu.memref_squeeze %86 : memref<1x!tpu.dma_semaphore, #tpu.memory_space<semaphore_mem>> -> memref<!tpu.dma_semaphore, #tpu.memory_space<semaphore_mem>>
    tpu.wait_dma2 semaphore(%87 : memref<!tpu.dma_semaphore, #tpu.memory_space<semaphore_mem>>) src(%84 : memref<1x128xf32, #tpu.memory_space<any>>) dst(%85 : memref<1x128xf32, #tpu.memory_space<vmem>>)
    %c2_i32_56 = arith.constant 2 : i32
    %c0_i32_57 = arith.constant 0 : i32
    %88 = tpu.memref_slice %arg2[%10, %c0_i32_57] : memref<256x128xf32, #tpu.memory_space<any>> -> memref<1x128xf32, #tpu.memory_space<any>>
    %c2_i32_58 = arith.constant 2 : i32
    %c0_i32_59 = arith.constant 0 : i32
    %89 = tpu.memref_slice %arg6[%c2_i32_58, %c0_i32_59] : memref<16x128xf32, #tpu.memory_space<vmem>> -> memref<1x128xf32, #tpu.memory_space<vmem>>
    %90 = tpu.memref_slice %arg7[%c2_i32_56] : memref<16x!tpu.dma_semaphore, #tpu.memory_space<semaphore_mem>> -> memref<1x!tpu.dma_semaphore, #tpu.memory_space<semaphore_mem>>
    %91 = tpu.memref_squeeze %90 : memref<1x!tpu.dma_semaphore, #tpu.memory_space<semaphore_mem>> -> memref<!tpu.dma_semaphore, #tpu.memory_space<semaphore_mem>>
    tpu.wait_dma2 semaphore(%91 : memref<!tpu.dma_semaphore, #tpu.memory_space<semaphore_mem>>) src(%88 : memref<1x128xf32, #tpu.memory_space<any>>) dst(%89 : memref<1x128xf32, #tpu.memory_space<vmem>>)
    %c3_i32_60 = arith.constant 3 : i32
    %c0_i32_61 = arith.constant 0 : i32
    %92 = tpu.memref_slice %arg2[%15, %c0_i32_61] : memref<256x128xf32, #tpu.memory_space<any>> -> memref<1x128xf32, #tpu.memory_space<any>>
    %c3_i32_62 = arith.constant 3 : i32
    %c0_i32_63 = arith.constant 0 : i32
    %93 = tpu.memref_slice %arg6[%c3_i32_62, %c0_i32_63] : memref<16x128xf32, #tpu.memory_space<vmem>> -> memref<1x128xf32, #tpu.memory_space<vmem>>
    %94 = tpu.memref_slice %arg7[%c3_i32_60] : memref<16x!tpu.dma_semaphore, #tpu.memory_space<semaphore_mem>> -> memref<1x!tpu.dma_semaphore, #tpu.memory_space<semaphore_mem>>
    %95 = tpu.memref_squeeze %94 : memref<1x!tpu.dma_semaphore, #tpu.memory_space<semaphore_mem>> -> memref<!tpu.dma_semaphore, #tpu.memory_space<semaphore_mem>>
    tpu.wait_dma2 semaphore(%95 : memref<!tpu.dma_semaphore, #tpu.memory_space<semaphore_mem>>) src(%92 : memref<1x128xf32, #tpu.memory_space<any>>) dst(%93 : memref<1x128xf32, #tpu.memory_space<vmem>>)
    %c4_i32_64 = arith.constant 4 : i32
    %c0_i32_65 = arith.constant 0 : i32
    %96 = tpu.memref_slice %arg2[%20, %c0_i32_65] : memref<256x128xf32, #tpu.memory_space<any>> -> memref<1x128xf32, #tpu.memory_space<any>>
    %c4_i32_66 = arith.constant 4 : i32
    %c0_i32_67 = arith.constant 0 : i32
    %97 = tpu.memref_slice %arg6[%c4_i32_66, %c0_i32_67] : memref<16x128xf32, #tpu.memory_space<vmem>> -> memref<1x128xf32, #tpu.memory_space<vmem>>
    %98 = tpu.memref_slice %arg7[%c4_i32_64] : memref<16x!tpu.dma_semaphore, #tpu.memory_space<semaphore_mem>> -> memref<1x!tpu.dma_semaphore, #tpu.memory_space<semaphore_mem>>
    %99 = tpu.memref_squeeze %98 : memref<1x!tpu.dma_semaphore, #tpu.memory_space<semaphore_mem>> -> memref<!tpu.dma_semaphore, #tpu.memory_space<semaphore_mem>>
    tpu.wait_dma2 semaphore(%99 : memref<!tpu.dma_semaphore, #tpu.memory_space<semaphore_mem>>) src(%96 : memref<1x128xf32, #tpu.memory_space<any>>) dst(%97 : memref<1x128xf32, #tpu.memory_space<vmem>>)
    %c5_i32_68 = arith.constant 5 : i32
    %c0_i32_69 = arith.constant 0 : i32
    %100 = tpu.memref_slice %arg2[%25, %c0_i32_69] : memref<256x128xf32, #tpu.memory_space<any>> -> memref<1x128xf32, #tpu.memory_space<any>>
    %c5_i32_70 = arith.constant 5 : i32
    %c0_i32_71 = arith.constant 0 : i32
    %101 = tpu.memref_slice %arg6[%c5_i32_70, %c0_i32_71] : memref<16x128xf32, #tpu.memory_space<vmem>> -> memref<1x128xf32, #tpu.memory_space<vmem>>
    %102 = tpu.memref_slice %arg7[%c5_i32_68] : memref<16x!tpu.dma_semaphore, #tpu.memory_space<semaphore_mem>> -> memref<1x!tpu.dma_semaphore, #tpu.memory_space<semaphore_mem>>
    %103 = tpu.memref_squeeze %102 : memref<1x!tpu.dma_semaphore, #tpu.memory_space<semaphore_mem>> -> memref<!tpu.dma_semaphore, #tpu.memory_space<semaphore_mem>>
    tpu.wait_dma2 semaphore(%103 : memref<!tpu.dma_semaphore, #tpu.memory_space<semaphore_mem>>) src(%100 : memref<1x128xf32, #tpu.memory_space<any>>) dst(%101 : memref<1x128xf32, #tpu.memory_space<vmem>>)
    %c6_i32_72 = arith.constant 6 : i32
    %c0_i32_73 = arith.constant 0 : i32
    %104 = tpu.memref_slice %arg2[%30, %c0_i32_73] : memref<256x128xf32, #tpu.memory_space<any>> -> memref<1x128xf32, #tpu.memory_space<any>>
    %c6_i32_74 = arith.constant 6 : i32
    %c0_i32_75 = arith.constant 0 : i32
    %105 = tpu.memref_slice %arg6[%c6_i32_74, %c0_i32_75] : memref<16x128xf32, #tpu.memory_space<vmem>> -> memref<1x128xf32, #tpu.memory_space<vmem>>
    %106 = tpu.memref_slice %arg7[%c6_i32_72] : memref<16x!tpu.dma_semaphore, #tpu.memory_space<semaphore_mem>> -> memref<1x!tpu.dma_semaphore, #tpu.memory_space<semaphore_mem>>
    %107 = tpu.memref_squeeze %106 : memref<1x!tpu.dma_semaphore, #tpu.memory_space<semaphore_mem>> -> memref<!tpu.dma_semaphore, #tpu.memory_space<semaphore_mem>>
    tpu.wait_dma2 semaphore(%107 : memref<!tpu.dma_semaphore, #tpu.memory_space<semaphore_mem>>) src(%104 : memref<1x128xf32, #tpu.memory_space<any>>) dst(%105 : memref<1x128xf32, #tpu.memory_space<vmem>>)
    %c7_i32_76 = arith.constant 7 : i32
    %c0_i32_77 = arith.constant 0 : i32
    %108 = tpu.memref_slice %arg2[%35, %c0_i32_77] : memref<256x128xf32, #tpu.memory_space<any>> -> memref<1x128xf32, #tpu.memory_space<any>>
    %c7_i32_78 = arith.constant 7 : i32
    %c0_i32_79 = arith.constant 0 : i32
    %109 = tpu.memref_slice %arg6[%c7_i32_78, %c0_i32_79] : memref<16x128xf32, #tpu.memory_space<vmem>> -> memref<1x128xf32, #tpu.memory_space<vmem>>
    %110 = tpu.memref_slice %arg7[%c7_i32_76] : memref<16x!tpu.dma_semaphore, #tpu.memory_space<semaphore_mem>> -> memref<1x!tpu.dma_semaphore, #tpu.memory_space<semaphore_mem>>
    %111 = tpu.memref_squeeze %110 : memref<1x!tpu.dma_semaphore, #tpu.memory_space<semaphore_mem>> -> memref<!tpu.dma_semaphore, #tpu.memory_space<semaphore_mem>>
    tpu.wait_dma2 semaphore(%111 : memref<!tpu.dma_semaphore, #tpu.memory_space<semaphore_mem>>) src(%108 : memref<1x128xf32, #tpu.memory_space<any>>) dst(%109 : memref<1x128xf32, #tpu.memory_space<vmem>>)
    %c8_i32_80 = arith.constant 8 : i32
    %c0_i32_81 = arith.constant 0 : i32
    %112 = tpu.memref_slice %arg2[%40, %c0_i32_81] : memref<256x128xf32, #tpu.memory_space<any>> -> memref<1x128xf32, #tpu.memory_space<any>>
    %c8_i32_82 = arith.constant 8 : i32
    %c0_i32_83 = arith.constant 0 : i32
    %113 = tpu.memref_slice %arg6[%c8_i32_82, %c0_i32_83] : memref<16x128xf32, #tpu.memory_space<vmem>> -> memref<1x128xf32, #tpu.memory_space<vmem>>
    %114 = tpu.memref_slice %arg7[%c8_i32_80] : memref<16x!tpu.dma_semaphore, #tpu.memory_space<semaphore_mem>> -> memref<1x!tpu.dma_semaphore, #tpu.memory_space<semaphore_mem>>
    %115 = tpu.memref_squeeze %114 : memref<1x!tpu.dma_semaphore, #tpu.memory_space<semaphore_mem>> -> memref<!tpu.dma_semaphore, #tpu.memory_space<semaphore_mem>>
    tpu.wait_dma2 semaphore(%115 : memref<!tpu.dma_semaphore, #tpu.memory_space<semaphore_mem>>) src(%112 : memref<1x128xf32, #tpu.memory_space<any>>) dst(%113 : memref<1x128xf32, #tpu.memory_space<vmem>>)
    %c9_i32_84 = arith.constant 9 : i32
    %c0_i32_85 = arith.constant 0 : i32
    %116 = tpu.memref_slice %arg2[%45, %c0_i32_85] : memref<256x128xf32, #tpu.memory_space<any>> -> memref<1x128xf32, #tpu.memory_space<any>>
    %c9_i32_86 = arith.constant 9 : i32
    %c0_i32_87 = arith.constant 0 : i32
    %117 = tpu.memref_slice %arg6[%c9_i32_86, %c0_i32_87] : memref<16x128xf32, #tpu.memory_space<vmem>> -> memref<1x128xf32, #tpu.memory_space<vmem>>
    %118 = tpu.memref_slice %arg7[%c9_i32_84] : memref<16x!tpu.dma_semaphore, #tpu.memory_space<semaphore_mem>> -> memref<1x!tpu.dma_semaphore, #tpu.memory_space<semaphore_mem>>
    %119 = tpu.memref_squeeze %118 : memref<1x!tpu.dma_semaphore, #tpu.memory_space<semaphore_mem>> -> memref<!tpu.dma_semaphore, #tpu.memory_space<semaphore_mem>>
    tpu.wait_dma2 semaphore(%119 : memref<!tpu.dma_semaphore, #tpu.memory_space<semaphore_mem>>) src(%116 : memref<1x128xf32, #tpu.memory_space<any>>) dst(%117 : memref<1x128xf32, #tpu.memory_space<vmem>>)
    %c10_i32_88 = arith.constant 10 : i32
    %c0_i32_89 = arith.constant 0 : i32
    %120 = tpu.memref_slice %arg2[%50, %c0_i32_89] : memref<256x128xf32, #tpu.memory_space<any>> -> memref<1x128xf32, #tpu.memory_space<any>>
    %c10_i32_90 = arith.constant 10 : i32
    %c0_i32_91 = arith.constant 0 : i32
    %121 = tpu.memref_slice %arg6[%c10_i32_90, %c0_i32_91] : memref<16x128xf32, #tpu.memory_space<vmem>> -> memref<1x128xf32, #tpu.memory_space<vmem>>
    %122 = tpu.memref_slice %arg7[%c10_i32_88] : memref<16x!tpu.dma_semaphore, #tpu.memory_space<semaphore_mem>> -> memref<1x!tpu.dma_semaphore, #tpu.memory_space<semaphore_mem>>
    %123 = tpu.memref_squeeze %122 : memref<1x!tpu.dma_semaphore, #tpu.memory_space<semaphore_mem>> -> memref<!tpu.dma_semaphore, #tpu.memory_space<semaphore_mem>>
    tpu.wait_dma2 semaphore(%123 : memref<!tpu.dma_semaphore, #tpu.memory_space<semaphore_mem>>) src(%120 : memref<1x128xf32, #tpu.memory_space<any>>) dst(%121 : memref<1x128xf32, #tpu.memory_space<vmem>>)
    %c11_i32_92 = arith.constant 11 : i32
    %c0_i32_93 = arith.constant 0 : i32
    %124 = tpu.memref_slice %arg2[%55, %c0_i32_93] : memref<256x128xf32, #tpu.memory_space<any>> -> memref<1x128xf32, #tpu.memory_space<any>>
    %c11_i32_94 = arith.constant 11 : i32
    %c0_i32_95 = arith.constant 0 : i32
    %125 = tpu.memref_slice %arg6[%c11_i32_94, %c0_i32_95] : memref<16x128xf32, #tpu.memory_space<vmem>> -> memref<1x128xf32, #tpu.memory_space<vmem>>
    %126 = tpu.memref_slice %arg7[%c11_i32_92] : memref<16x!tpu.dma_semaphore, #tpu.memory_space<semaphore_mem>> -> memref<1x!tpu.dma_semaphore, #tpu.memory_space<semaphore_mem>>
    %127 = tpu.memref_squeeze %126 : memref<1x!tpu.dma_semaphore, #tpu.memory_space<semaphore_mem>> -> memref<!tpu.dma_semaphore, #tpu.memory_space<semaphore_mem>>
    tpu.wait_dma2 semaphore(%127 : memref<!tpu.dma_semaphore, #tpu.memory_space<semaphore_mem>>) src(%124 : memref<1x128xf32, #tpu.memory_space<any>>) dst(%125 : memref<1x128xf32, #tpu.memory_space<vmem>>)
    %c12_i32_96 = arith.constant 12 : i32
    %c0_i32_97 = arith.constant 0 : i32
    %128 = tpu.memref_slice %arg2[%60, %c0_i32_97] : memref<256x128xf32, #tpu.memory_space<any>> -> memref<1x128xf32, #tpu.memory_space<any>>
    %c12_i32_98 = arith.constant 12 : i32
    %c0_i32_99 = arith.constant 0 : i32
    %129 = tpu.memref_slice %arg6[%c12_i32_98, %c0_i32_99] : memref<16x128xf32, #tpu.memory_space<vmem>> -> memref<1x128xf32, #tpu.memory_space<vmem>>
    %130 = tpu.memref_slice %arg7[%c12_i32_96] : memref<16x!tpu.dma_semaphore, #tpu.memory_space<semaphore_mem>> -> memref<1x!tpu.dma_semaphore, #tpu.memory_space<semaphore_mem>>
    %131 = tpu.memref_squeeze %130 : memref<1x!tpu.dma_semaphore, #tpu.memory_space<semaphore_mem>> -> memref<!tpu.dma_semaphore, #tpu.memory_space<semaphore_mem>>
    tpu.wait_dma2 semaphore(%131 : memref<!tpu.dma_semaphore, #tpu.memory_space<semaphore_mem>>) src(%128 : memref<1x128xf32, #tpu.memory_space<any>>) dst(%129 : memref<1x128xf32, #tpu.memory_space<vmem>>)
    %c13_i32_100 = arith.constant 13 : i32
    %c0_i32_101 = arith.constant 0 : i32
    %132 = tpu.memref_slice %arg2[%65, %c0_i32_101] : memref<256x128xf32, #tpu.memory_space<any>> -> memref<1x128xf32, #tpu.memory_space<any>>
    %c13_i32_102 = arith.constant 13 : i32
    %c0_i32_103 = arith.constant 0 : i32
    %133 = tpu.memref_slice %arg6[%c13_i32_102, %c0_i32_103] : memref<16x128xf32, #tpu.memory_space<vmem>> -> memref<1x128xf32, #tpu.memory_space<vmem>>
    %134 = tpu.memref_slice %arg7[%c13_i32_100] : memref<16x!tpu.dma_semaphore, #tpu.memory_space<semaphore_mem>> -> memref<1x!tpu.dma_semaphore, #tpu.memory_space<semaphore_mem>>
    %135 = tpu.memref_squeeze %134 : memref<1x!tpu.dma_semaphore, #tpu.memory_space<semaphore_mem>> -> memref<!tpu.dma_semaphore, #tpu.memory_space<semaphore_mem>>
    tpu.wait_dma2 semaphore(%135 : memref<!tpu.dma_semaphore, #tpu.memory_space<semaphore_mem>>) src(%132 : memref<1x128xf32, #tpu.memory_space<any>>) dst(%133 : memref<1x128xf32, #tpu.memory_space<vmem>>)
    %c14_i32_104 = arith.constant 14 : i32
    %c0_i32_105 = arith.constant 0 : i32
    %136 = tpu.memref_slice %arg2[%70, %c0_i32_105] : memref<256x128xf32, #tpu.memory_space<any>> -> memref<1x128xf32, #tpu.memory_space<any>>
    %c14_i32_106 = arith.constant 14 : i32
    %c0_i32_107 = arith.constant 0 : i32
    %137 = tpu.memref_slice %arg6[%c14_i32_106, %c0_i32_107] : memref<16x128xf32, #tpu.memory_space<vmem>> -> memref<1x128xf32, #tpu.memory_space<vmem>>
    %138 = tpu.memref_slice %arg7[%c14_i32_104] : memref<16x!tpu.dma_semaphore, #tpu.memory_space<semaphore_mem>> -> memref<1x!tpu.dma_semaphore, #tpu.memory_space<semaphore_mem>>
    %139 = tpu.memref_squeeze %138 : memref<1x!tpu.dma_semaphore, #tpu.memory_space<semaphore_mem>> -> memref<!tpu.dma_semaphore, #tpu.memory_space<semaphore_mem>>
    tpu.wait_dma2 semaphore(%139 : memref<!tpu.dma_semaphore, #tpu.memory_space<semaphore_mem>>) src(%136 : memref<1x128xf32, #tpu.memory_space<any>>) dst(%137 : memref<1x128xf32, #tpu.memory_space<vmem>>)
    %c15_i32_108 = arith.constant 15 : i32
    %c0_i32_109 = arith.constant 0 : i32
    %140 = tpu.memref_slice %arg2[%75, %c0_i32_109] : memref<256x128xf32, #tpu.memory_space<any>> -> memref<1x128xf32, #tpu.memory_space<any>>
    %c15_i32_110 = arith.constant 15 : i32
    %c0_i32_111 = arith.constant 0 : i32
    %141 = tpu.memref_slice %arg6[%c15_i32_110, %c0_i32_111] : memref<16x128xf32, #tpu.memory_space<vmem>> -> memref<1x128xf32, #tpu.memory_space<vmem>>
    %142 = tpu.memref_slice %arg7[%c15_i32_108] : memref<16x!tpu.dma_semaphore, #tpu.memory_space<semaphore_mem>> -> memref<1x!tpu.dma_semaphore, #tpu.memory_space<semaphore_mem>>
    %143 = tpu.memref_squeeze %142 : memref<1x!tpu.dma_semaphore, #tpu.memory_space<semaphore_mem>> -> memref<!tpu.dma_semaphore, #tpu.memory_space<semaphore_mem>>
    tpu.wait_dma2 semaphore(%143 : memref<!tpu.dma_semaphore, #tpu.memory_space<semaphore_mem>>) src(%140 : memref<1x128xf32, #tpu.memory_space<any>>) dst(%141 : memref<1x128xf32, #tpu.memory_space<vmem>>)
    %c0_112 = arith.constant 0 : index
    %c0_113 = arith.constant 0 : index
    %144 = vector.load %arg6[%c0_112, %c0_113] : memref<16x128xf32, #tpu.memory_space<vmem>>, vector<16x128xf32>
    %145 = arith.truncf %144 : vector<16x128xf32> to vector<16x128xbf16>
    %c0_114 = arith.constant 0 : index
    %c0_115 = arith.constant 0 : index
    %146 = vector.load %arg3[%c0_114, %c0_115] : memref<128x128xbf16, #tpu.memory_space<vmem>>, vector<128x128xbf16>
    %cst = arith.constant dense<0.000000e+00> : vector<16x128xf32>
    %147 = tpu.matmul %145, %146, %cst {dimension_numbers = #tpu.dot_dimension_numbers<[1], [1], [0], [0], [0, 0, 1, 0], [], []>} : vector<16x128xbf16>, vector<128x128xbf16>, vector<16x128xf32> -> vector<16x128xf32>
    %c0_116 = arith.constant 0 : index
    %c0_117 = arith.constant 0 : index
    %148 = vector.load %arg4[%c0_116, %c0_117] : memref<1x128xf32, #tpu.memory_space<vmem>>, vector<1x128xf32>
    %149 = vector.broadcast %148 : vector<1x128xf32> to vector<16x128xf32>
    %150 = arith.addf %147, %149 : vector<16x128xf32>
    %c0_118 = arith.constant 0 : index
    %c0_119 = arith.constant 0 : index
    %151 = vector.load %arg5[%c0_118, %c0_119] : memref<16x128xf32, #tpu.memory_space<vmem>>, vector<16x128xf32>
    tpu.vector_store %arg5[%c0_118, %c0_119], %150 {strides = array<i32>} : memref<16x128xf32, #tpu.memory_space<vmem>>, vector<16x128xf32>,
    return
  }
  func.func @transform_1(%arg0: i32, %arg1: memref<16xi32, #tpu.memory_space<smem>>) -> (i32, i32) {
    %c0_i32 = arith.constant 0 : i32
    %c0_i32_0 = arith.constant 0 : i32
    return %arg0, %c0_i32 : i32, i32
  }
  func.func @transform_2(%arg0: i32, %arg1: memref<16xi32, #tpu.memory_space<smem>>) -> (i32, i32) {
    %c0_i32 = arith.constant 0 : i32
    %c0_i32_0 = arith.constant 0 : i32
    return %c0_i32, %arg0 : i32, i32
  }
  func.func @transform_3(%arg0: i32, %arg1: memref<16xi32, #tpu.memory_space<smem>>) -> (i32, i32) {
    %c0_i32 = arith.constant 0 : i32
    %c0_i32_0 = arith.constant 0 : i32
    return %c0_i32, %arg0 : i32, i32
  }
}

</mosaic_0001>

<bundles_post_ra>
// kernel: word2vec_forward.1
= control target key start
LH: loop header
LB: loop body
LE: loop exit
PB: predicated region body
PF: predicated region fallthrough
CT: control target
= control target key end

     0   :  { %s1407_s18 = smov [#allocation5]   ;;  %s1603_s0 = inlined_call_operand.vmem [shape: s32[16], index: 0, kind: input, shape index: {}]   ;;  %s1604_s1 = inlined_call_operand.vmem [shape: f32[256,128], index: 1, kind: input, shape index: {}]   ;;  %s1605_s2 = inlined_call_operand.vmem [shape: bf16[256,128], index: 2, kind: input, shape index: {}]   ;;  %s1606_s3 = inlined_call_operand.vmem [shape: f32[1,256], index: 3, kind: input, shape index: {}]   ;;  %s1607_s4 = inlined_call_operand.hbm [shape: f32[16,256], index: 4, kind: output, shape index: {}]  }
   0x1   :  { %s10_s17 = sshll.u32 %s1603_s0, 4  ;;  %s11_s17 = int_to_ptr.vmem [resolvable:$true] %s10_s17 }
   0x2   :  { %13 = dma.vmem_to_smem %s11_s17, 16, %s1407_s18, [#allocation4] }
   0x3   :  { %1353 = dma.done.wait [#allocation4], 16 }
   0x4   :  { %1354 = vsyncadd [#allocation4], 4294967280 }
   0x5   :  { %16 = sfence }
   0x6   :  { %17 = vsyncpa [#allocation7], 0 }
   0x7   :  { %19 = vsyncpa [#allocation7 + $0x1], 0  ;;  %s1439_s19 = smov 0   ;;  %s1441_s20 = smov 0  }
   0x8   :  { %s1443_s21 = smov 0   ;;  %s1445_s22 = smov 0  }
   0x9 LB: > { %s1460_s0 = sadd.s32 4294967295, %s1405_s22   ;;  %s1171_s23 = sadd.s32 4294967294, %s1405_s22   ;;  %s1405_s22 = sphi %s1445_s22, %s1613_s22   ;;  %s1401_s21 = sphi %s1443_s21, %s1612_s21   ;;  %s1397_s20 = sphi %s1441_s20, %s1611_s20   ;;  %s1393_s19 = sphi %s1439_s19, %s1610_s19  }
   0xa   : > { %s1464_s24 = sadd.s32 1, %s1405_s22   ;;  %s84_s25 = sadd.s32 1, %s1401_s21 }
   0xb   : > { %s81_s26 = ssub.s32 %s1405_s22, %s1464_s24  ;;  %p94_p0 = scmp.ne.s32.totalorder %s1401_s21, %s1397_s20 }
   0xc   : > { %p82_p1 = scmp.eq.s32.totalorder %s81_s26, 0  ;;  %p95_p2 = scmp.eq.s32.totalorder %s1460_s0, 1 }
   0xd   : > { %p100_p3 = scmp.ne.s32.totalorder %s1397_s20, %s1393_s19  ;;  %p101_p4 = scmp.eq.s32.totalorder %s1171_s23, 1 }
   0xe   : > { %s1475_s27 = scalar_select %p82_p1, %s1401_s21, %s84_s25  }
   0xf   : > { %p1477_p5 = por %p95_p2, %p94_p0  ;;  %p1481_p6 = por %p101_p4, %p100_p3 }
  0x10   : > { %p1174_p7 = scmp.ge.s32.totalorder %s1405_s22, 1  ;;  %p134_p8 = scmp.lt.s32.totalorder %s1405_s22, 3 }
  0x12   : > { %p135_p9 = pnand %p1174_p7, %p134_p8 }
  0x13   : > { %s156_s30 = sand.u32 (!%p135_p9), 1, %s1397_s20   ;;  %s1176_s5 = sshll.u32 (!%p135_p9), %s1460_s0, 4 }
  0x14   : > { %138 = sbr.rel (%p135_p9) target bundleno = 404 (0x194), region = 28  ;;  %s1175_s6 = sshll.u32 (!%p135_p9), %s156_s30, 4 }
  0x15   : > { %p160_p10 = scmp.lt.s32.totalorder (!%p135_p9), %s1176_s5, 31  ;;  %p165_p11 = scmp.lt.s32.totalorder (!%p135_p9), %s1460_s0, 1 }
  0x16   : > { %s168_s9 = sld [smem:[#allocation5]] (!%p135_p9)  ;;  %s1507_s23 = scalar_lea.vmem (!%p135_p9), [#allocation6], %s1175_s6 }
  0x19   : > { %s1615_s5 = smov (!%p160_p10, %s1176_s5), 31 }
  0x1a   : > { %s1493_s7 = scalar_select %p165_p11, %s1460_s0, 1 }
  0x1b   : > { %s1177_s8 = sshll.u32 %s1615_s5, 2 }
  0x1c   : > { %s1498_s12 = scalar_lea.vmem %s1605_s2, %s1177_s8  ;;  %s167_s15 = scalar_lea.vmem %s1606_s3, %s1493_s7 }
  0x1d   : > { %s169_s18 = scalar_lea.vmem %s1604_s1, %s168_s9 }
  0x1e   : > { %v184_v0 = vld [vmem:[%s169_s18] sm:$0x1] }
  0x1f   : > { %185 = vst [vmem:[#allocation2] sm:$0x1] %v184_v0 }
  0x20   : > { %203 = vsyncadd [#allocation3], 16  ;;  %s1178_s25 = sld [smem:[#allocation5 + $0x1]] }
  0x26   : > { %s205_s10 = scalar_lea.vmem %s1604_s1, %s1178_s25 }
  0x27   : > { %v222_v1 = vld [vmem:[%s205_s10] sm:$0x1] }
  0x28   : > { %223 = vst [vmem:[#allocation2 + $0x1] sm:$0x1] %v222_v1 }
  0x29   : > { %241 = vsyncadd [#allocation3 + $0x1], 16  ;;  %s1179_s8 = sld [smem:[#allocation5 + $0x2]] }
  0x2f   : > { %s243_s14 = scalar_lea.vmem %s1604_s1, %s1179_s8 }
  0x30   : > { %v260_v2 = vld [vmem:[%s243_s14] sm:$0x1] }
  0x31   : > { %261 = vst [vmem:[#allocation2 + $0x2] sm:$0x1] %v260_v2 }
  0x32   : > { %279 = vsyncadd [#allocation3 + $0x2], 16  ;;  %s1180_s9 = sld [smem:[#allocation5 + $0x3]] }
  0x38   : > { %s281_s17 = scalar_lea.vmem %s1604_s1, %s1180_s9 }
  0x39   : > { %v298_v3 = vld [vmem:[%s281_s17] sm:$0x1] }
  0x3a   : > { %299 = vst [vmem:[#allocation2 + $0x3] sm:$0x1] %v298_v3 }
  0x3b   : > { %317 = vsyncadd [#allocation3 + $0x3], 16  ;;  %s1181_s18 = sld [smem:[#allocation5 + $0x4]] }
  0x41   : > { %s319_s5 = scalar_lea.vmem %s1604_s1, %s1181_s18 }
  0x42   : > { %v336_v4 = vld [vmem:[%s319_s5] sm:$0x1] }
  0x43   : > { %337 = vst [vmem:[#allocation2 + $0x4] sm:$0x1] %v336_v4 }
  0x44   : > { %355 = vsyncadd [#allocation3 + $0x4], 16  ;;  %s1182_s10 = sld [smem:[#allocation5 + $0x5]] }
  0x4a   : > { %s357_s13 = scalar_lea.vmem %s1604_s1, %s1182_s10 }
  0x4b   : > { %v374_v5 = vld [vmem:[%s357_s13] sm:$0x1] }
  0x4c   : > { %375 = vst [vmem:[#allocation2 + $0x5] sm:$0x1] %v374_v5 }
  0x4d   : > { %393 = vsyncadd [#allocation3 + $0x5], 16  ;;  %s1183_s14 = sld [smem:[#allocation5 + $0x6]] }
  0x53   : > { %s395_s16 = scalar_lea.vmem %s1604_s1, %s1183_s14 }
  0x54   : > { %v412_v6 = vld [vmem:[%s395_s16] sm:$0x1] }
  0x55   : > { %413 = vst [vmem:[#allocation2 + $0x6] sm:$0x1] %v412_v6 }
  0x56   : > { %431 = vsyncadd [#allocation3 + $0x6], 16  ;;  %s1184_s17 = sld [smem:[#allocation5 + $0x7]] }
  0x5c   : > { %s433_s26 = scalar_lea.vmem %s1604_s1, %s1184_s17 }
  0x5d   : > { %v450_v7 = vld [vmem:[%s433_s26] sm:$0x1] }
  0x5e   : > { %451 = vst [vmem:[#allocation2 + $0x7] sm:$0x1] %v450_v7 }
  0x5f   : > { %469 = vsyncadd [#allocation3 + $0x7], 16  ;;  %s1185_s5 = sld [smem:[#allocation5 + $0x8]] }
  0x65   : > { %s471_s11 = scalar_lea.vmem %s1604_s1, %s1185_s5 }
  0x66   : > { %v488_v8 = vld [vmem:[%s471_s11] sm:$0x1] }
  0x67   : > { %489 = vst [vmem:[#allocation2 + $0x8] sm:$0x1] %v488_v8 }
  0x68   : > { %507 = vsyncadd [#allocation3 + $0x8], 16  ;;  %s1186_s13 = sld [smem:[#allocation5 + $0x9]] }
  0x6e   : > { %s509_s6 = scalar_lea.vmem %s1604_s1, %s1186_s13 }
  0x6f   : > { %v526_v9 = vld [vmem:[%s509_s6] sm:$0x1] }
  0x70   : > { %527 = vst [vmem:[#allocation2 + $0x9] sm:$0x1] %v526_v9 }
  0x71   : > { %545 = vsyncadd [#allocation3 + $0x9], 16  ;;  %s1187_s16 = sld [smem:[#allocation5 + $0xa]] }
  0x77   : > { %s547_s25 = scalar_lea.vmem %s1604_s1, %s1187_s16 }
  0x78   : > { %v564_v10 = vld [vmem:[%s547_s25] sm:$0x1] }
  0x79   : > { %565 = vst [vmem:[#allocation2 + $0xa] sm:$0x1] %v564_v10 }
  0x7a   : > { %583 = vsyncadd [#allocation3 + $0xa], 16  ;;  %s1188_s26 = sld [smem:[#allocation5 + $0xb]] }
  0x80   : > { %s585_s8 = scalar_lea.vmem %s1604_s1, %s1188_s26 }
  0x81   : > { %v602_v11 = vld [vmem:[%s585_s8] sm:$0x1] }
  0x82   : > { %603 = vst [vmem:[#allocation2 + $0xb] sm:$0x1] %v602_v11 }
  0x83   : > { %621 = vsyncadd [#allocation3 + $0xb], 16  ;;  %s1189_s11 = sld [smem:[#allocation5 + $0xc]] }
  0x89   : > { %s623_s9 = scalar_lea.vmem %s1604_s1, %s1189_s11 }
  0x8a   : > { %v640_v12 = vld [vmem:[%s623_s9] sm:$0x1] }
  0x8b   : > { %641 = vst [vmem:[#allocation2 + $0xc] sm:$0x1] %v640_v12 }
  0x8c   : > { %659 = vsyncadd [#allocation3 + $0xc], 16  ;;  %s1190_s6 = sld [smem:[#allocation5 + $0xd]] }
  0x92   : > { %s661_s18 = scalar_lea.vmem %s1604_s1, %s1190_s6 }
  0x93   : > { %v678_v13 = vld [vmem:[%s661_s18] sm:$0x1] }
  0x94   : > { %679 = vst [vmem:[#allocation2 + $0xd] sm:$0x1] %v678_v13 }
  0x95   : > { %697 = vsyncadd [#allocation3 + $0xd], 16  ;;  %s1191_s25 = sld [smem:[#allocation5 + $0xe]] }
  0x9b   : > { %s699_s10 = scalar_lea.vmem %s1604_s1, %s1191_s25 }
  0x9c   : > { %v716_v14 = vld [vmem:[%s699_s10] sm:$0x1] }
  0x9d   : > { %717 = vst [vmem:[#allocation2 + $0xe] sm:$0x1] %v716_v14 }
  0x9e   : > { %735 = vsyncadd [#allocation3 + $0xe], 16  ;;  %s1192_s8 = sld [smem:[#allocation5 + $0xf]] }
  0xa4   : > { %s737_s14 = scalar_lea.vmem %s1604_s1, %s1192_s8 }
  0xa5   : > { %v754_v15 = vld [vmem:[%s737_s14] sm:$0x1] }
  0xa6   : > { %755 = vst [vmem:[#allocation2 + $0xf] sm:$0x1] %v754_v15 }
  0xa7   : > { %773 = vsyncadd [#allocation3 + $0xf], 16 }
  0xa8   : > { %1355 = dma.done.wait [#allocation3], 16 }
  0xa9   : > { %1356 = vsyncadd [#allocation3], 4294967280 }
  0xaa   : > { %1357 = dma.done.wait [#allocation3 + $0x1], 16 }
  0xab   : > { %1358 = vsyncadd [#allocation3 + $0x1], 4294967280 }
  0xac   : > { %1359 = dma.done.wait [#allocation3 + $0x2], 16 }
  0xad   : > { %1360 = vsyncadd [#allocation3 + $0x2], 4294967280 }
  0xae   : > { %1361 = dma.done.wait [#allocation3 + $0x3], 16 }
  0xaf   : > { %1362 = vsyncadd [#allocation3 + $0x3], 4294967280 }
  0xb0   : > { %1363 = dma.done.wait [#allocation3 + $0x4], 16 }
  0xb1   : > { %1364 = vsyncadd [#allocation3 + $0x4], 4294967280 }
  0xb2   : > { %1365 = dma.done.wait [#allocation3 + $0x5], 16 }
  0xb3   : > { %1366 = vsyncadd [#allocation3 + $0x5], 4294967280 }
  0xb4   : > { %1367 = dma.done.wait [#allocation3 + $0x6], 16 }
  0xb5   : > { %1368 = vsyncadd [#allocation3 + $0x6], 4294967280 }
  0xb6   : > { %1369 = dma.done.wait [#allocation3 + $0x7], 16 }
  0xb7   : > { %1370 = vsyncadd [#allocation3 + $0x7], 4294967280 }
  0xb8   : > { %1371 = dma.done.wait [#allocation3 + $0x8], 16 }
  0xb9   : > { %1372 = vsyncadd [#allocation3 + $0x8], 4294967280 }
  0xba   : > { %1373 = dma.done.wait [#allocation3 + $0x9], 16 }
  0xbb   : > { %1374 = vsyncadd [#allocation3 + $0x9], 4294967280 }
  0xbc   : > { %1375 = dma.done.wait [#allocation3 + $0xa], 16 }
  0xbd   : > { %1376 = vsyncadd [#allocation3 + $0xa], 4294967280 }
  0xbe   : > { %1377 = dma.done.wait [#allocation3 + $0xb], 16 }
  0xbf   : > { %1378 = vsyncadd [#allocation3 + $0xb], 4294967280 }
  0xc0   : > { %1379 = dma.done.wait [#allocation3 + $0xc], 16 }
  0xc1   : > { %1380 = vsyncadd [#allocation3 + $0xc], 4294967280 }
  0xc2   : > { %1381 = dma.done.wait [#allocation3 + $0xd], 16 }
  0xc3   : > { %1382 = vsyncadd [#allocation3 + $0xd], 4294967280 }
  0xc4   : > { %1383 = dma.done.wait [#allocation3 + $0xe], 16 }
  0xc5   : > { %1384 = vsyncadd [#allocation3 + $0xe], 4294967280 }
  0xc6   : > { %1385 = dma.done.wait [#allocation3 + $0xf], 16 }
  0xc7   : > { %1386 = vsyncadd [#allocation3 + $0xf], 4294967280  ;;  %v1252_v16 = vld [vmem:[%s1498_s12 + $0x38] sm:$0xff]  ;;  %v1251_v17 = vld [vmem:[%s1498_s12 + $0x30] sm:$0xff]  ;;  %s1226_s16 = sshll.u32 %s1460_s0, 3  ;;  %s906_s25 = sshll.u32 %s1507_s23, 4  ;;  %s907_s25 = int_to_ptr.vmem [resolvable:$true] %s906_s25 }
  0xc8   : > { %878 = vmatpush.bf16.xpose.msra.mxu0 %v1252_v16  ;;  %v1250_v18 = vld [vmem:[%s1498_s12 + $0x28] sm:$0xff]  ;;  %v1249_v19 = vld [vmem:[%s1498_s12 + $0x20] sm:$0xff]  ;;  %v1248_v20 = vld [vmem:[%s1498_s12 + $0x18] sm:$0xff]  ;;  %s895_s5 = scalar_lea.sflag [#allocation7], %s156_s30  ;;  %s1329_s8 = scalar_lea.hbm %s1607_s4, 32 }
  0xc9   : > { %v1247_v21 = vld [vmem:[%s1498_s12 + $0x10] sm:$0xff]  ;;  %v1246_v22 = vld [vmem:[%s1498_s12 + $0x8] sm:$0xff]  ;;  %v1245_v23 = vld [vmem:[%s1498_s12] sm:$0xff]  ;;  %s905_s12 = scalar_lea.hbm %s1607_s4, %s1226_s16 }
  0xca   : > { %v807_v24 = vld [vmem:[#allocation2] sm:$0xff]  ;;  %v808_v25 = vld [vmem:[#allocation2 + $0x8] sm:$0xff]  ;;  %s908_s26 = sshll.u32 %s905_s12, 4  ;;  %s909_s26 = int_to_ptr.hbm [resolvable:$true] %s908_s26 }
  0xcb   : > { %v809_v26 = vpack.c.bf16 %v808_v25, %v807_v24  ;;  %v1296_v27 = vld [vmem:[%s167_s15] ss:$0 sm:$0xff]  ;;  %s1323_s7 = sshra.s32 %s909_s26, 4  ;;  %s1324_s7 = int_to_ptr.hbm [resolvable:$true] %s1323_s7 }
  0xcc   : > { %s1325_s0 = scalar_lea.hbm %s1324_s7, 16  ;;  %p1330_p1 = scmp.lt.s32.totalorder %s1324_s7, %s1607_s4 }
  0xcd   : > { %p1326_p12 = scmp.ne.s32.totalorder %s1324_s7, %s1325_s0  ;;  %p1331_p2 = scmp.lt.s32.totalorder %s1329_s8, %s1325_s0 }
  0xcf   : > { %p1327_p13 = pnand %p1326_p12, %p1477_p5  ;;  %p1332_p3 = por %p1331_p2, %p1330_p1 }
  0xd0   : > { %879 = vmatpush.bf16.xpose.msra.mxu0 %v1251_v17 }
  0xd1   : > { %p1328_p0 = pneg %p1327_p13 }
  0xd3   : > { %p1333_p4 = pnand %p1332_p3, %p1328_p0 }
  0xd8   : > { %880 = vmatpush.bf16.xpose.msra.mxu0 %v1250_v18 }
  0xe0   : > { %881 = vmatpush.bf16.xpose.msra.mxu0 %v1249_v19 }
  0xe8   : > { %882 = vmatpush.bf16.xpose.msra.mxu0 %v1248_v20 }
  0xf0   : > { %883 = vmatpush.bf16.xpose.msra.mxu0 %v1247_v21 }
  0xf8   : > { %884 = vmatpush.bf16.xpose.msra.mxu0 %v1246_v22 }
 0x100   : > { %885 = vmatpush.bf16.xpose.msra.mxu0 %v1245_v23 }
 0x107   : > { %886 = vmatmul.bf16.vlgmr.msra.gmra.mxu0 %v809_v26 }
 0x184   : > { %v887_v28 = vpop.f32.mrf.mxu0 }
 0x185   : > { %v888_v29 = vadd.f32 %v1296_v27, %v887_v28 }
 0x187   : > { %892 = vst [vmem:[%s1507_s23] sm:$0xff] %v888_v29 }
 0x18c   : > { %v889_v30 = vpop.f32.mrf.mxu0 }
 0x18d   : > { %v890_v31 = vadd.f32 %v1296_v27, %v889_v30 }
 0x18f   : > { %893 = vst [vmem:[%s1507_s23 + $0x8] sm:$0xff] %v890_v31 }
 0x190   : > { %1336 = shalt.err (!%p1333_p4)
}
 0x191   : > { %s1408_s30 = smov 128   ;;  %s1409_s23 = smov 256  }
 0x192   : > { %s1410_s14 = smov 8  }
 0x193   : > { %1253 = dma.vmem_to_hbm [thread:$0]  (%p1477_p5), %s907_s25, 256, %s909_s26, %s895_s5, %s1408_s30, %s1409_s23, %s1410_s14  }
 0x194 PF: > { %p1259_p7 = scmp.ge.s32.totalorder %s1405_s22, 2  ;;  %s923_s9 = sand.u32 1, %s1393_s19  }
 0x195   : > { %s924_s6 = scalar_lea.sflag [#allocation7], %s923_s9 }
 0x196   : > { %p1256_p8 = pnand %p1259_p7, %p1481_p6 }
 0x198   : > { %p1257_p9 = pneg %p1256_p8 }
 0x19a   : > { %1388 = dma.done.wait (%p1257_p9), %s924_s6, 256  }
 0x19b   : > { %1390 = vsyncadd (%p1257_p9), %s924_s6, 4294967040  ;;  %p22_p10 = scmp.ge.s32.totalorder %s1464_s24, 4   ;;  %s1610_s19 = smov %s1397_s20 }
 0x19c   : > { %s1611_s20 = smov %s1401_s21  ;;  %s1612_s21 = smov %s1475_s27 }
 0x19d   : > { %s1613_s22 = smov %s1464_s24  ;;  %24 = sbr.rel (!%p22_p10) target bundleno = 9 (0x9), region = 671 }
 0x1a2   :  { %930 = vsyncpa [#allocation7], 1 }
 0x1a3   :  { %932 = vsyncpa [#allocation7 + $0x1], 1 }
 0x1a4   :  { %933 = vsyncmov [#allocation3] }
 0x1a7   :  { %s934_s22 = vpop.sfrf %933 }
 0x1a8   :  { %p1229_p5 = scmp.ne.s32.totalorder %s934_s22, 0 }
 0x1aa   :  { %938 = shalt.err (%p1229_p5)  }
 0x1ab   :  { %940 = vsyncmov [#allocation3 + $0x1] }
 0x1ae   :  { %s941_s28 = vpop.sfrf %940 }
 0x1af   :  { %p1230_p6 = scmp.ne.s32.totalorder %s941_s28, 0 }
 0x1b1   :  { %945 = shalt.err (%p1230_p6)  }
 0x1b2   :  { %947 = vsyncmov [#allocation3 + $0x2] }
 0x1b5   :  { %s948_s29 = vpop.sfrf %947 }
 0x1b6   :  { %p1231_p11 = scmp.ne.s32.totalorder %s948_s29, 0 }
 0x1b8   :  { %952 = shalt.err (%p1231_p11)  }
 0x1b9   :  { %954 = vsyncmov [#allocation3 + $0x3] }
 0x1bc   :  { %s955_s16 = vpop.sfrf %954 }
 0x1bd   :  { %p1232_p12 = scmp.ne.s32.totalorder %s955_s16, 0 }
 0x1bf   :  { %959 = shalt.err (%p1232_p12)  }
 0x1c0   :  { %961 = vsyncmov [#allocation3 + $0x4] }
 0x1c3   :  { %s962_s24 = vpop.sfrf %961 }
 0x1c4   :  { %p1233_p13 = scmp.ne.s32.totalorder %s962_s24, 0 }
 0x1c6   :  { %966 = shalt.err (%p1233_p13)  }
 0x1c7   :  { %968 = vsyncmov [#allocation3 + $0x5] }
 0x1ca   :  { %s969_s1 = vpop.sfrf %968 }
 0x1cb   :  { %p1234_p0 = scmp.ne.s32.totalorder %s969_s1, 0 }
 0x1cd   :  { %973 = shalt.err (%p1234_p0)  }
 0x1ce   :  { %975 = vsyncmov [#allocation3 + $0x6] }
 0x1d1   :  { %s976_s2 = vpop.sfrf %975 }
 0x1d2   :  { %p1235_p1 = scmp.ne.s32.totalorder %s976_s2, 0 }
 0x1d4   :  { %980 = shalt.err (%p1235_p1)  }
 0x1d5   :  { %982 = vsyncmov [#allocation3 + $0x7] }
 0x1d8   :  { %s983_s3 = vpop.sfrf %982 }
 0x1d9   :  { %p1236_p2 = scmp.ne.s32.totalorder %s983_s3, 0 }
 0x1db   :  { %987 = shalt.err (%p1236_p2)  }
 0x1dc   :  { %989 = vsyncmov [#allocation3 + $0x8] }
 0x1df   :  { %s990_s4 = vpop.sfrf %989 }
 0x1e0   :  { %p1237_p3 = scmp.ne.s32.totalorder %s990_s4, 0 }
 0x1e2   :  { %994 = shalt.err (%p1237_p3)  }
 0x1e3   :  { %996 = vsyncmov [#allocation3 + $0x9] }
 0x1e6   :  { %s997_s19 = vpop.sfrf %996 }
 0x1e7   :  { %p1238_p4 = scmp.ne.s32.totalorder %s997_s19, 0 }
 0x1e9   :  { %1001 = shalt.err (%p1238_p4)  }
 0x1ea   :  { %1003 = vsyncmov [#allocation3 + $0xa] }
 0x1ed   :  { %s1004_s20 = vpop.sfrf %1003 }
 0x1ee   :  { %p1239_p7 = scmp.ne.s32.totalorder %s1004_s20, 0 }
 0x1f0   :  { %1008 = shalt.err (%p1239_p7)  }
 0x1f1   :  { %1010 = vsyncmov [#allocation3 + $0xb] }
 0x1f4   :  { %s1011_s21 = vpop.sfrf %1010 }
 0x1f5   :  { %p1240_p8 = scmp.ne.s32.totalorder %s1011_s21, 0 }
 0x1f7   :  { %1015 = shalt.err (%p1240_p8)  }
 0x1f8   :  { %1017 = vsyncmov [#allocation3 + $0xc] }
 0x1fb   :  { %s1018_s27 = vpop.sfrf %1017 }
 0x1fc   :  { %p1241_p9 = scmp.ne.s32.totalorder %s1018_s27, 0 }
 0x1fe   :  { %1022 = shalt.err (%p1241_p9)  }
 0x1ff   :  { %1024 = vsyncmov [#allocation3 + $0xd] }
 0x202   :  { %s1025_s17 = vpop.sfrf %1024 }
 0x203   :  { %p1242_p10 = scmp.ne.s32.totalorder %s1025_s17, 0 }
 0x205   :  { %1029 = shalt.err (%p1242_p10)  }
 0x206   :  { %1031 = vsyncmov [#allocation3 + $0xe] }
 0x209   :  { %s1032_s18 = vpop.sfrf %1031 }
 0x20a   :  { %p1243_p5 = scmp.ne.s32.totalorder %s1032_s18, 0 }
 0x20c   :  { %1036 = shalt.err (%p1243_p5)  }
 0x20d   :  { %1038 = vsyncmov [#allocation3 + $0xf] }
 0x210   :  { %s1039_s12 = vpop.sfrf %1038 }
 0x211   :  { %p1244_p6 = scmp.ne.s32.totalorder %s1039_s12, 0 }
 0x213   :  { %1043 = shalt.err (%p1244_p6)  }

</bundles_post_ra>
